<compile_context>
chip_gen: v6e
topology: v6e:2x2x1
jax: 0.10.0
libtpu: 0.0.40
codegen_flags: <defaults>
</compile_context>

<pallas_src>
import functools

import jax
import jax.numpy as jnp
from jax.experimental import pallas as pl
from jax.experimental.pallas import tpu as pltpu

BN_EPS = 1e-5           # nn.BatchNorm1d default
OUT_W = 128             # lane-dense output slab width (one full lane tile)

_VMEM = pl.BlockSpec(memory_space=pltpu.MemorySpace.VMEM)


# ----------------------------- static layout ---------------------------------

def _layout(feature_dim, num_classes, num_hidden_layers, hidden_size,
            z_dim, s_dim, lambda_dim):
    """Static row/column layout of the packed parameter array and output slab."""
    H = hidden_size
    lay = {}
    # Output-slab columns (all five heads live in one (B, OUT_W) slab).
    lay["c_mu"] = 0
    lay["c_lv"] = z_dim
    lay["c_lam"] = 2 * z_dim
    lay["c_mus"] = 2 * z_dim + lambda_dim
    lay["c_lvs"] = 2 * z_dim + lambda_dim + s_dim
    lay["out_used"] = 2 * z_dim + lambda_dim + 2 * s_dim
    lay["elu_end"] = 2 * z_dim + lambda_dim          # ELU on [mu | logvar | weight]
    assert lay["out_used"] <= OUT_W
    # Packed parameter array (NROWS, OUT_W + H):
    #   cols [0:OUT_W]       -> slab-aligned head weights (x-heads / z-heads)
    #   cols [OUT_W:OUT_W+H] -> hidden-width weights (z_fc1 x-part, hidden stack)
    lay["ncols"] = OUT_W + H
    r = 0
    lay["r_wx"] = (r, r + feature_dim); r += feature_dim     # fused x-path weight
    lay["r_bx"] = r; r += 1                                  # fused x-path bias
    lay["r_w1y"] = (r, r + num_classes); r += num_classes    # z_fc1 weight, y_hat part
    hid = []
    for _ in range(num_hidden_layers):
        rw = (r, r + H); r += H                              # hidden Linear weight
        rv = (r, r + 3); r += 3                              # rows: bias, gamma, beta
        hid.append((rw, rv))
    lay["r_hid"] = tuple(hid)
    lay["r_wz"] = (r, r + H); r += H                         # [z_fc_mu | z_fc_logvar]
    lay["r_bz"] = r; r += 1                                  # its fused bias
    lay["nrows"] = r
    return lay


# ----------------------------- Pallas kernel ---------------------------------

@functools.lru_cache(maxsize=None)
def _make_z_encoder_kernel(feature_dim, num_classes, num_hidden_layers,
                           hidden_size, z_dim, s_dim, lambda_dim):
    H = hidden_size
    lay = _layout(feature_dim, num_classes, num_hidden_layers, hidden_size,
                  z_dim, s_dim, lambda_dim)
    elu_end = lay["elu_end"]

    def kernel(x_ref, y_ref, p_ref, o_ref):
        x = x_ref[...]

        # x-path: ONE fused matmul covering z_fc1(x-part), fc_lambda,
        # fc_mu_s, fc_logvar_s; biases (b1, b_mu_s, b_logvar_s) folded into one row.
        r0, r1 = lay["r_wx"]
        rb = lay["r_bx"]
        xfused = (jnp.dot(x, p_ref[r0:r1, :], preferred_element_type=jnp.float32)
                  + p_ref[rb:rb + 1, :])                       # (B, OUT_W + H)

        # z_fc1: add the y_hat contribution (cat(x,y)@W1 == x@W1x + y@W1y), ReLU.
        ry0, ry1 = lay["r_w1y"]
        h = xfused[:, OUT_W:OUT_W + H] + jnp.dot(
            y_ref[...], p_ref[ry0:ry1, :H], preferred_element_type=jnp.float32)
        h = jnp.maximum(h, 0.0)

        # Hidden stack: Linear -> BatchNorm1d (training-mode batch stats) -> ReLU.
        for rw, rv in lay["r_hid"]:
            a = (jnp.dot(h, p_ref[rw[0]:rw[1], :H],
                         preferred_element_type=jnp.float32)
                 + p_ref[rv[0]:rv[0] + 1, :H])                 # + bias
            gamma = p_ref[rv[0] + 1:rv[0] + 2, :H]
            beta = p_ref[rv[0] + 2:rv[0] + 3, :H]
            mean = jnp.mean(a, axis=0, keepdims=True)
            var = jnp.mean((a - mean) * (a - mean), axis=0, keepdims=True)  # two-pass
            scale = gamma * jax.lax.rsqrt(var + BN_EPS)        # (1, H) precompute
            shift = beta - mean * scale
            h = jnp.maximum(a * scale + shift, 0.0)            # 2 VPU ops / element

        # Heads: z-heads occupy slab cols [0:2z]; x-heads already sit in the
        # disjoint cols [2z : 2z+L+2s] of xfused -> one add, one (B,128) store.
        rz0, rz1 = lay["r_wz"]
        rbz = lay["r_bz"]
        slab = (xfused[:, :OUT_W]
                + jnp.dot(h, p_ref[rz0:rz1, :OUT_W],
                          preferred_element_type=jnp.float32)
                + p_ref[rbz:rbz + 1, :OUT_W])

        # ELU on [mu | logvar | weight], identity on [mu_s | logvar_s] and padding.
        # exp(min(v,0)) - 1 keeps the discarded branch finite (no exp of large +v).
        elu = jnp.where(slab > 0.0, slab, jnp.exp(jnp.minimum(slab, 0.0)) - 1.0)
        col = jax.lax.broadcasted_iota(jnp.int32, slab.shape, 1)
        o_ref[...] = jnp.where(col < elu_end, elu, slab)       # single unmasked store

    return kernel


# ----------------------------- module factory ---------------------------------

def make_z_encoder(feature_dim=2, num_classes=2, num_hidden_layers=1,
                   hidden_size=5, z_dim=2, s_dim=2, lambda_dim=1):
    """Returns (init, forward, reference) for the fused Pallas Z_Encoder."""
    H, F, C = hidden_size, feature_dim, num_classes
    Z, S, L = z_dim, s_dim, lambda_dim
    lay = _layout(F, C, num_hidden_layers, H, Z, S, L)
    kernel = _make_z_encoder_kernel(F, C, num_hidden_layers, H, Z, S, L)

    def init(key):
        # NOTE: the PyTorch module declares fc_lambda / fc_mu_s / fc_logvar_s with
        # in_features=hidden_size but applies them to x (width feature_dim); we size
        # them to feature_dim so the forward is well-defined for feature_dim != hidden_size.
        keys = iter(jax.random.split(key, 16 + 4 * num_hidden_layers))

        def rnd(shape, scale=0.2):
            return scale * jax.random.normal(next(keys), shape, jnp.float32)

        raw = dict(
            w1x=rnd((F, H)), w1y=rnd((C, H)), b1=rnd((1, H)),
            hidden=[dict(w=rnd((H, H)), b=rnd((1, H)),
                         gamma=jnp.ones((1, H), jnp.float32),
                         beta=jnp.zeros((1, H), jnp.float32))
                    for _ in range(num_hidden_layers)],
            wz_mu=rnd((H, Z)), bz_mu=rnd((1, Z)),
            wz_lv=rnd((H, Z)), bz_lv=rnd((1, Z)),
            wlam=rnd((F, L)),
            wmus=rnd((F, S)), bmus=rnd((1, S)),
            wlvs=rnd((F, S)), blvs=rnd((1, S)),
        )

        # Pack everything once into ONE contiguous f32 array (single input DMA).
        P = jnp.zeros((lay["nrows"], lay["ncols"]), jnp.float32)
        r0, r1 = lay["r_wx"]
        P = P.at[r0:r1, lay["c_lam"]:lay["c_lam"] + L].set(raw["wlam"])
        P = P.at[r0:r1, lay["c_mus"]:lay["c_mus"] + S].set(raw["wmus"])
        P = P.at[r0:r1, lay["c_lvs"]:lay["c_lvs"] + S].set(raw["wlvs"])
        P = P.at[r0:r1, OUT_W:OUT_W + H].set(raw["w1x"])
        rb = lay["r_bx"]
        P = P.at[rb, lay["c_mus"]:lay["c_mus"] + S].set(raw["bmus"][0])
        P = P.at[rb, lay["c_lvs"]:lay["c_lvs"] + S].set(raw["blvs"][0])
        P = P.at[rb, OUT_W:OUT_W + H].set(raw["b1"][0])
        ry0, ry1 = lay["r_w1y"]
        P = P.at[ry0:ry1, :H].set(raw["w1y"])
        for (rw, rv), lyr in zip(lay["r_hid"], raw["hidden"]):
            P = P.at[rw[0]:rw[1], :H].set(lyr["w"])
            P = P.at[rv[0], :H].set(lyr["b"][0])
            P = P.at[rv[0] + 1, :H].set(lyr["gamma"][0])
            P = P.at[rv[0] + 2, :H].set(lyr["beta"][0])
        rz0, rz1 = lay["r_wz"]
        P = P.at[rz0:rz1, lay["c_mu"]:lay["c_mu"] + Z].set(raw["wz_mu"])
        P = P.at[rz0:rz1, lay["c_lv"]:lay["c_lv"] + Z].set(raw["wz_lv"])
        rbz = lay["r_bz"]
        P = P.at[rbz, lay["c_mu"]:lay["c_mu"] + Z].set(raw["bz_mu"][0])
        P = P.at[rbz, lay["c_lv"]:lay["c_lv"] + Z].set(raw["bz_lv"][0])
        return P, raw

    def forward(packed, x, y_hat):
        B = x.shape[0]
        o = pl.pallas_call(
            kernel,
            out_shape=jax.ShapeDtypeStruct((B, OUT_W), jnp.float32),
            in_specs=[_VMEM, _VMEM, _VMEM],
            out_specs=_VMEM,
            compiler_params=pltpu.CompilerParams(
                vmem_limit_bytes=32 * 1024 * 1024),
        )(x.astype(jnp.float32), y_hat.astype(jnp.float32), packed)
        mu = o[:, lay["c_mu"]:lay["c_mu"] + Z]
        log_var = o[:, lay["c_lv"]:lay["c_lv"] + Z]
        weight = o[:, lay["c_lam"]:lay["c_lam"] + L]
        mu_s = o[:, lay["c_mus"]:lay["c_mus"] + S]
        log_var_s = o[:, lay["c_lvs"]:lay["c_lvs"] + S]
        return mu, log_var, weight, mu_s, log_var_s

    def reference(raw, x, y_hat):
        """Pure-JAX reference matching the PyTorch forward (training-mode BN)."""
        h = jax.nn.relu(x @ raw["w1x"] + y_hat @ raw["w1y"] + raw["b1"])
        for lyr in raw["hidden"]:
            a = h @ lyr["w"] + lyr["b"]
            mean = jnp.mean(a, axis=0, keepdims=True)
            var = jnp.mean((a - mean) ** 2, axis=0, keepdims=True)
            a = lyr["gamma"] * (a - mean) / jnp.sqrt(var + BN_EPS) + lyr["beta"]
            h = jax.nn.relu(a)
        mu = jax.nn.elu(h @ raw["wz_mu"] + raw["bz_mu"])
        log_var = jax.nn.elu(h @ raw["wz_lv"] + raw["bz_lv"])
        weight = jax.nn.elu(x @ raw["wlam"])
        mu_s = x @ raw["wmus"] + raw["bmus"]
        log_var_s = x @ raw["wlvs"] + raw["blvs"]
        return mu, log_var, weight, mu_s, log_var_s

    return init, forward, reference


# ----------------------------- main -------------------------------------------

if __name__ == "__main__":
    B, feature_dim, num_classes = 8, 2, 2
    hidden_size, num_hidden_layers = 5, 1
    z_dim, s_dim, lambda_dim = 2, 2, 1

    key = jax.random.PRNGKey(0)
    kx, ky, kp = jax.random.split(key, 3)
    x = jax.random.normal(kx, (B, feature_dim), jnp.float32)
    y_hat = jax.random.normal(ky, (B, num_classes), jnp.float32)

    init, forward, reference = make_z_encoder(
        feature_dim=feature_dim, num_classes=num_classes,
        num_hidden_layers=num_hidden_layers, hidden_size=hidden_size,
        z_dim=z_dim, s_dim=s_dim, lambda_dim=lambda_dim)
    packed, raw = init(kp)

    outs = jax.jit(forward)(packed, x, y_hat)
    outs = jax.block_until_ready(outs)

    shapes = [tuple(o.shape) for o in outs]
    assert shapes == [(B, z_dim), (B, z_dim), (B, lambda_dim),
                      (B, s_dim), (B, s_dim)], shapes
    assert all(bool(jnp.all(jnp.isfinite(o))) for o in outs)

    # Tolerance check against the pure-JAX reference (loose: default MXU precision).
    refs = reference(raw, x, y_hat)
    for o, r in zip(outs, refs):
        err = jnp.max(jnp.abs(o - r))
        assert bool(jnp.all(jnp.abs(o - r) <= 2e-2 + 2e-2 * jnp.abs(r))), float(err)

    print("KERNEL_OK")
</pallas_src>

<mosaic_0001>
module attributes {stable_mosaic.version = 11 : i64} {
  func.func @kernel(%arg0: memref<8x2xf32, #tpu.memory_space<vmem>>, %arg1: memref<8x2xf32, #tpu.memory_space<vmem>>, %arg2: memref<19x133xf32, #tpu.memory_space<vmem>>, %arg3: memref<8x128xf32, #tpu.memory_space<vmem>>) attributes {dimension_semantics = [], scalar_prefetch = 0 : i64, scratch_operands = 0 : i64, tpu.core_type = #tpu.core_type<tc>} {
    %c0 = arith.constant 0 : index
    %c0_0 = arith.constant 0 : index
    %0 = vector.load %arg0[%c0, %c0_0] : memref<8x2xf32, #tpu.memory_space<vmem>>, vector<8x2xf32>
    %c0_1 = arith.constant 0 : index
    %c0_2 = arith.constant 0 : index
    %1 = vector.load %arg2[%c0_1, %c0_2] : memref<19x133xf32, #tpu.memory_space<vmem>>, vector<2x133xf32>
    %cst = arith.constant dense<0.000000e+00> : vector<8x133xf32>
    %2 = tpu.matmul %0, %1, %cst {dimension_numbers = #tpu.dot_dimension_numbers<[1], [0], [0], [1], [0, 0, 1, 1], [], []>} : vector<8x2xf32>, vector<2x133xf32>, vector<8x133xf32> -> vector<8x133xf32>
    %c2 = arith.constant 2 : index
    %c0_3 = arith.constant 0 : index
    %3 = vector.load %arg2[%c2, %c0_3] : memref<19x133xf32, #tpu.memory_space<vmem>>, vector<1x133xf32>
    %4 = vector.broadcast %3 : vector<1x133xf32> to vector<8x133xf32>
    %5 = arith.addf %2, %4 : vector<8x133xf32>
    %6 = vector.extract_strided_slice %5 {offsets = [0, 128], sizes = [8, 5], strides = [1, 1]} : vector<8x133xf32> to vector<8x5xf32>
    %c0_4 = arith.constant 0 : index
    %c0_5 = arith.constant 0 : index
    %7 = vector.load %arg1[%c0_4, %c0_5] : memref<8x2xf32, #tpu.memory_space<vmem>>, vector<8x2xf32>
    %c3 = arith.constant 3 : index
    %c0_6 = arith.constant 0 : index
    %8 = vector.load %arg2[%c3, %c0_6] : memref<19x133xf32, #tpu.memory_space<vmem>>, vector<2x5xf32>
    %cst_7 = arith.constant dense<0.000000e+00> : vector<8x5xf32>
    %9 = tpu.matmul %7, %8, %cst_7 {dimension_numbers = #tpu.dot_dimension_numbers<[1], [0], [0], [1], [0, 0, 1, 1], [], []>} : vector<8x2xf32>, vector<2x5xf32>, vector<8x5xf32> -> vector<8x5xf32>
    %10 = arith.addf %6, %9 : vector<8x5xf32>
    %cst_8 = arith.constant 0.000000e+00 : f32
    %11 = vector.broadcast %cst_8 : f32 to vector<8x5xf32>
    %12 = arith.maximumf %10, %11 : vector<8x5xf32>
    %c5 = arith.constant 5 : index
    %c0_9 = arith.constant 0 : index
    %13 = vector.load %arg2[%c5, %c0_9] : memref<19x133xf32, #tpu.memory_space<vmem>>, vector<5x5xf32>
    %cst_10 = arith.constant dense<0.000000e+00> : vector<8x5xf32>
    %14 = tpu.matmul %12, %13, %cst_10 {dimension_numbers = #tpu.dot_dimension_numbers<[1], [0], [0], [1], [0, 0, 1, 1], [], []>} : vector<8x5xf32>, vector<5x5xf32>, vector<8x5xf32> -> vector<8x5xf32>
    %c10 = arith.constant 10 : index
    %c0_11 = arith.constant 0 : index
    %15 = vector.load %arg2[%c10, %c0_11] : memref<19x133xf32, #tpu.memory_space<vmem>>, vector<1x5xf32>
    %16 = vector.broadcast %15 : vector<1x5xf32> to vector<8x5xf32>
    %17 = arith.addf %14, %16 : vector<8x5xf32>
    %c11 = arith.constant 11 : index
    %c0_12 = arith.constant 0 : index
    %18 = vector.load %arg2[%c11, %c0_12] : memref<19x133xf32, #tpu.memory_space<vmem>>, vector<1x5xf32>
    %c12 = arith.constant 12 : index
    %c0_13 = arith.constant 0 : index
    %19 = vector.load %arg2[%c12, %c0_13] : memref<19x133xf32, #tpu.memory_space<vmem>>, vector<1x5xf32>
    %cst_14 = arith.constant dense<0.000000e+00> : vector<5xf32>
    %20 = vector.multi_reduction <add>, %17, %cst_14 [0] : vector<8x5xf32> to vector<5xf32>
    %21 = vector.shape_cast %20 : vector<5xf32> to vector<1x5xf32>
    %cst_15 = arith.constant 8.000000e+00 : f32
    %22 = vector.broadcast %cst_15 : f32 to vector<1x5xf32>
    %23 = arith.divf %21, %22 : vector<1x5xf32>
    %24 = vector.broadcast %23 : vector<1x5xf32> to vector<8x5xf32>
    %25 = arith.subf %17, %24 : vector<8x5xf32>
    %26 = vector.broadcast %23 : vector<1x5xf32> to vector<8x5xf32>
    %27 = arith.subf %17, %26 : vector<8x5xf32>
    %28 = arith.mulf %25, %27 : vector<8x5xf32>
    %cst_16 = arith.constant dense<0.000000e+00> : vector<5xf32>
    %29 = vector.multi_reduction <add>, %28, %cst_16 [0] : vector<8x5xf32> to vector<5xf32>
    %30 = vector.shape_cast %29 : vector<5xf32> to vector<1x5xf32>
    %cst_17 = arith.constant 8.000000e+00 : f32
    %31 = vector.broadcast %cst_17 : f32 to vector<1x5xf32>
    %32 = arith.divf %30, %31 : vector<1x5xf32>
    %cst_18 = arith.constant 9.99999974E-6 : f32
    %33 = vector.broadcast %cst_18 : f32 to vector<1x5xf32>
    %34 = arith.addf %32, %33 : vector<1x5xf32>
    %35 = math.rsqrt %34 : vector<1x5xf32>
    %36 = arith.mulf %18, %35 : vector<1x5xf32>
    %37 = arith.mulf %23, %36 : vector<1x5xf32>
    %38 = arith.subf %19, %37 : vector<1x5xf32>
    %39 = vector.broadcast %36 : vector<1x5xf32> to vector<8x5xf32>
    %40 = arith.mulf %17, %39 : vector<8x5xf32>
    %41 = vector.broadcast %38 : vector<1x5xf32> to vector<8x5xf32>
    %42 = arith.addf %40, %41 : vector<8x5xf32>
    %cst_19 = arith.constant 0.000000e+00 : f32
    %43 = vector.broadcast %cst_19 : f32 to vector<8x5xf32>
    %44 = arith.maximumf %42, %43 : vector<8x5xf32>
    %45 = vector.extract_strided_slice %5 {offsets = [0, 0], sizes = [8, 128], strides = [1, 1]} : vector<8x133xf32> to vector<8x128xf32>
    %c13 = arith.constant 13 : index
    %c0_20 = arith.constant 0 : index
    %46 = vector.load %arg2[%c13, %c0_20] : memref<19x133xf32, #tpu.memory_space<vmem>>, vector<5x128xf32>
    %cst_21 = arith.constant dense<0.000000e+00> : vector<8x128xf32>
    %47 = tpu.matmul %44, %46, %cst_21 {dimension_numbers = #tpu.dot_dimension_numbers<[1], [0], [0], [1], [0, 0, 1, 1], [], []>} : vector<8x5xf32>, vector<5x128xf32>, vector<8x128xf32> -> vector<8x128xf32>
    %48 = arith.addf %45, %47 : vector<8x128xf32>
    %c18 = arith.constant 18 : index
    %c0_22 = arith.constant 0 : index
    %49 = vector.load %arg2[%c18, %c0_22] : memref<19x133xf32, #tpu.memory_space<vmem>>, vector<1x128xf32>
    %50 = vector.broadcast %49 : vector<1x128xf32> to vector<8x128xf32>
    %51 = arith.addf %48, %50 : vector<8x128xf32>
    %cst_23 = arith.constant 0.000000e+00 : f32
    %52 = vector.broadcast %cst_23 : f32 to vector<8x128xf32>
    %53 = arith.cmpf ogt, %51, %52 : vector<8x128xf32>
    %cst_24 = arith.constant 0.000000e+00 : f32
    %54 = vector.broadcast %cst_24 : f32 to vector<8x128xf32>
    %55 = arith.minimumf %51, %54 : vector<8x128xf32>
    %56 = math.exp %55 : vector<8x128xf32>
    %cst_25 = arith.constant 1.000000e+00 : f32
    %57 = vector.broadcast %cst_25 : f32 to vector<8x128xf32>
    %58 = arith.subf %56, %57 : vector<8x128xf32>
    %59 = arith.select %53, %51, %58 : vector<8x128xi1>, vector<8x128xf32>
    %60 = tpu.iota {dimensions = array<i32: 1>} : vector<8x128xi32>
    %c5_i32 = arith.constant 5 : i32
    %61 = vector.broadcast %c5_i32 : i32 to vector<8x128xi32>
    %62 = arith.cmpi slt, %60, %61 : vector<8x128xi32>
    %63 = arith.select %62, %59, %51 : vector<8x128xi1>, vector<8x128xf32>
    %c0_26 = arith.constant 0 : index
    %c0_27 = arith.constant 0 : index
    %64 = vector.load %arg3[%c0_26, %c0_27] : memref<8x128xf32, #tpu.memory_space<vmem>>, vector<8x128xf32>
    tpu.vector_store %arg3[%c0_26, %c0_27], %63 {strides = array<i32>} : memref<8x128xf32, #tpu.memory_space<vmem>>, vector<8x128xf32>,
    return
  }
}

</mosaic_0001>

<bundles_post_ra>
// kernel: forward.1
= control target key start
LH: loop header
LB: loop body
LE: loop exit
PB: predicated region body
PF: predicated region fallthrough
CT: control target
= control target key end

     0   :  { %8 = vsyncpa [#allocation3], 0  ;;  %s485_s12 = smov [#allocation2]   ;;  %s535_s0 = inlined_call_operand.vmem [shape: f32[8,2], index: 0, kind: input, shape index: {}]   ;;  %s536_s1 = inlined_call_operand.vmem [shape: f32[8,2], index: 1, kind: input, shape index: {}]   ;;  %s537_s2 = inlined_call_operand.hbm [shape: f32[19,133], index: 2, kind: input, shape index: {}]   ;;  %s538_s3 = inlined_call_operand.vmem [shape: f32[8,128], index: 3, kind: output, shape index: {}]  }
   0x1   :  { %s18_s13 = sshll.u32 %s485_s12, 4  ;;  %s19_s13 = int_to_ptr.vmem [resolvable:$true] %s18_s13 }
   0x2   :  { %s471_s14 = scalar_lea.vmem %s19_s13, 768  ;;  %p476_p1 = scmp.lt.s32.totalorder %s19_s13, %s19_s13 }
   0x3   :  { %p472_p0 = scmp.ne.s32.totalorder %s19_s13, %s471_s14  ;;  %p477_p2 = scmp.lt.s32.totalorder %s471_s14, %s471_s14 }
   0x5   :  { %p478_p3 = por %p477_p2, %p476_p1 }
   0x7   :  { %p479_p4 = pnand %p478_p3, %p472_p0 }
   0x9   :  { %482 = shalt.err (!%p479_p4)
}
   0xa   :  { %s486_s15 = smov 256   ;;  %s487_s16 = smov 16  }
   0xb   :  { %24 = dma.hbm_to_vmem [thread:$0]  %s537_s2, 768, %s19_s13, [#allocation3], %s486_s15, %s486_s15, %s487_s16  }
   0xc   :  { %483 = dma.done.wait [#allocation3], 768  }
   0xd   :  { %484 = vsyncadd [#allocation3], 4294966528  ;;  %v488_v0 = vmov 0.0   ;;  %vm489_vm0 = vmmov 0   ;;  %vm48_vm1 = vcmask 1041408   ;;  %v28_v3 = vld [vmem:[%s535_s0] sm:$0xff]  ;;  %v34_v12 = vlaneseq }
   0xe   :  { %119 = vmatprep.mubr.f32.mxu0 %v488_v0  ;;  %439 = vmatprep.subr.mxu1 %v488_v0  ;;  %v30_v1 = vld [vmem:[#allocation2 + $0x8] sm:$0x3]  ;;  %v29_v2 = vld [vmem:[#allocation2] sm:$0x3]  ;;  %vm44_vm2 = vcmask 15360   ;;  %vm212_vm3 = vcmask 1042432  }
   0xf   :  { %441 = vmatprep.mubr.msk.f32.mxu1 %vm489_vm0, %v488_v0  ;;  %423 = vmatprep.subr.msk.mxu0 %vm48_vm1, %v30_v1  ;;  %v127_v4 = vld [vmem:[#allocation2] sm:$0x18]  ;;  %v207_v7 = vld [vmem:[#allocation2] sm:$0xe0]  ;;  %v208_v8 = vld [vmem:[#allocation2 + $0x10] sm:$0x3] }
  0x10   :  { %424 = vmatpush1.msk.msra.mxu0 %vm48_vm1, %v29_v2  ;;  %v129_v5 = vrot.slane %v127_v4, 3  ;;  %v126_v6 = vld [vmem:[%s536_s1] sm:$0xff]  ;;  %v213_v9 = vrot.slane %v207_v7, 5  ;;  %v214_v10 = vrot.slane %v208_v8, 5  ;;  %vm220_vm4 = vcmask 1044480  }
  0x11   :  { %425 = vmatmul.mubr.msk.f32.vlgmr.msra.gmra.mxu0 %vm44_vm2, %v28_v3  ;;  %444 = vmatprep.subr.mxu0 %v488_v0  ;;  %v35_v13 = vshrl.u32 %v34_v12, 7  ;;  %v32_v15 = vld [vmem:[#allocation2 + $0x2] ss:$8 sm:$0x3]  ;;  %vm216_vm5 = vcmask 39936   ;;  %v414_v7 = vand.u32 127, %v34_v12 }
  0x12   :  { %440 = vmatpush3.msk.msra.mxu1 %vm48_vm1, %v129_v5  ;;  %446 = vmatprep.mubr.msk.f32.mxu0 %vm489_vm0, %v488_v0  ;;  %v215_v11 = vsel %vm212_vm3, %v213_v9, %v214_v10  ;;  %v322_v24 = vld [vmem:[#allocation2 + $0x10] sm:$0xe0]  ;;  %v323_v25 = vld [vmem:[#allocation2 + $0x20] sm:$0x3]  ;;  %v209_v29 = vld [vmem:[#allocation2 + $0x12] ss:$0 sm:$0xff] }
  0x13   :  { %442 = vmatmul.mubr.msk.f32.vlgmr.msra.gmra.mxu1 %vm44_vm2, %v126_v6  ;;  %449 = vmatprep.subr.mxu1 %v488_v0  ;;  %v40_v14 = vsub.s32 1, %v35_v13  ;;  %v326_v26 = vrot.slane %v322_v24, 5  ;;  %v327_v27 = vrot.slane %v323_v25, 5  ;;  %v293_v52 = vld [vmem:[#allocation2 + $0x13] ss:$0 sm:$0xff]  ;;  %v36_v61 = vsub.s32 0, %v35_v13 }
  0x14   :  { %451 = vmatprep.mubr.msk.f32.mxu1 %vm489_vm0, %v488_v0  ;;  %445 = vmatpush3.msk.msra.mxu0 %vm220_vm4, %v215_v11  ;;  %v294_v55 = vld [vmem:[#allocation2 + $0x14] ss:$0 sm:$0xff]  ;;  %v405_v1 = vld [vmem:[#allocation2 + $0x22] ss:$0 sm:$0xff]  ;;  %vm415_vm6 = vcmp.lt.s32.totalorder %v414_v7, 5 }
  0x15   :  { %v41_v16 = vrot.slane %v32_v15, %v40_v14  ;;  %v328_v28 = vsel %vm212_vm3, %v326_v26, %v327_v27  ;;  %v37_v62 = vrot.slane %v32_v15, %v36_v61 }
  0x16   :  { %450 = vmatpush3.msk.msra.mxu1 %vm220_vm4, %v328_v28 }
  0xd1   :  { %v121_v17 = vpop.f32.mrf.mxu0 }
  0xd2   :  { %v122_v63 = vadd.f32 %v121_v17, %v37_v62 }
  0xd3   :  { %v123_v18 = vpop.f32.mrf.mxu0  ;;  %v201_v19 = vpop.f32.mrf.mxu1 }
  0xd4   :  { %v124_v20 = vadd.f32 %v123_v18, %v41_v16 }
  0xd5   :  { %v443_v21 = vpop.f32.mrf.mxu1 }
  0xd6   :  { %v205_v22 = vadd.f32 %v201_v19, %v124_v20 }
  0xd8   :  { %v206_v23 = vmax.f32 %v205_v22, 0.0 }
  0xda   :  { %447 = vmatmul.mubr.msk.f32.vlgmr.msra.gmra.mxu0 %vm216_vm5, %v206_v23 }
 0x19a   :  { %v289_v30 = vpop.f32.mrf.mxu0 }
 0x19b   :  { %v290_v31 = vadd.f32 %v289_v30, %v209_v29 }
 0x19c   :  { %v448_v32 = vpop.f32.mrf.mxu0 }
 0x19d   :  { %v295_v33 = vsel %vm216_vm5, %v290_v31, 0.0 }
 0x19e   :  { %v296_v34 = vrot.slane %v295_v33, 4 }
 0x1a0   :  { %v297_v35 = vadd.f32 %v296_v34, %v295_v33 }
 0x1a2   :  { %v298_v36 = vrot.slane %v297_v35, 2 }
 0x1a4   :  { %v299_v37 = vadd.f32 %v298_v36, %v297_v35 }
 0x1a6   :  { %v300_v38 = vrot.slane %v299_v37, 1 }
 0x1a8   :  { %v301_v39 = vadd.f32 %v300_v38, %v299_v37 }
 0x1aa   :  { %v303_v40 = vmul.f32 0.125, %v301_v39 }
 0x1ac   :  { %v304_v41 = vsub.f32 %v290_v31, %v303_v40 }
 0x1ae   :  { %v305_v42 = vmul.f32 %v304_v41, %v304_v41 }
 0x1b0   :  { %v306_v43 = vsel %vm216_vm5, %v305_v42, 0.0 }
 0x1b1   :  { %v307_v44 = vrot.slane %v306_v43, 4 }
 0x1b3   :  { %v308_v45 = vadd.f32 %v307_v44, %v306_v43 }
 0x1b5   :  { %v309_v46 = vrot.slane %v308_v45, 2 }
 0x1b7   :  { %v310_v47 = vadd.f32 %v309_v46, %v308_v45 }
 0x1b9   :  { %v311_v48 = vrot.slane %v310_v47, 1 }
 0x1bb   :  { %v312_v49 = vadd.f32 %v311_v48, %v310_v47 }
 0x1bd   :  { %v313_v50 = vmul.f32 0.125, %v312_v49 }
 0x1bf   :  { %v314_v51 = vadd.f32 1e-05, %v313_v50 }
 0x1c1   :  { %459 = vrsqrt.f32 %v314_v51 }
 0x1ce   :  { %v460_v53 = vpop.eup %459 }
 0x1cf   :  { %v316_v54 = vmul.f32 %v460_v53, %v293_v52 }
 0x1d1   :  { %v317_v56 = vmul.f32 %v316_v54, %v303_v40  ;;  %v319_v58 = vmul.f32 %v316_v54, %v290_v31 }
 0x1d3   :  { %v318_v57 = vsub.f32 %v294_v55, %v317_v56 }
 0x1d5   :  { %v320_v59 = vadd.f32 %v319_v58, %v318_v57 }
 0x1d7   :  { %v321_v60 = vmax.f32 %v320_v59, 0.0 }
 0x1d9   :  { %452 = vmatmul.mubr.msk.f32.vlgmr.msra.gmra.mxu1 %vm216_vm5, %v321_v60 }
 0x299   :  { %v400_v0 = vpop.f32.mrf.mxu1 }
 0x29a   :  { %v404_v2 = vadd.f32 %v400_v0, %v122_v63 }
 0x29b   :  { %v453_v3 = vpop.f32.mrf.mxu1 }
 0x29c   :  { %v406_v4 = vadd.f32 %v405_v1, %v404_v2 }
 0x29e   :  { %v408_v5 = vmin.f32 %v406_v4, 0.0  ;;  %vm407_vm7 = vcmp.gt.f32.partialorder %v406_v4, 0.0 }
 0x2a0   :  { %v409_v6 = vmul.f32 1.442695, %v408_v5 }
 0x2a2   :  { %461 = vpow2.f32 %v409_v6 }
 0x2af   :  { %v462_v8 = vpop.eup %461 }
 0x2b0   :  { %v432_v9 = vadd.f32 -1.0, %v462_v8 }
 0x2b2   :  { %v412_v10 = vsel %vm407_vm7, %v406_v4, %v432_v9 }
 0x2b3   :  { %v416_v11 = vsel %vm415_vm6, %v412_v10, %v406_v4 }
 0x2b4   :  { %417 = vst [vmem:[%s538_s3] sm:$0xff] %v416_v11 }
 0x2b5   :  { %422 = vsyncpa [#allocation3], 1 }

</bundles_post_ra>
